<compile_context>
chip_gen: v7x
topology: tpu7x:2x2x1
jax: 0.10.0
libtpu: 0.0.40
codegen_flags: <defaults>
</compile_context>

<pallas_src>
import functools

import jax
import jax.numpy as jnp
import numpy as np
from jax.experimental import pallas as pl
from jax.experimental.pallas import tpu as pltpu


# --------------------------------------------------------------------------
# Wrapper-side weight transform: "same"-padded KxK conv (2 in -> 1 out) as a
# dense matmul in the flat row-major layout.
#
#   cm[ci][rs*W + cs, r*W + c] = w_sp[0, ci, rs - r + p, cs - c + p]
#                                (0 when the tap falls outside [0, K))
# so for flat maps m_mean, m_max of shape (Nb, HW):
#   conv_flat = m_mean @ cm[0] + m_max @ cm[1]
# exactly reproduces nn.Conv2d(2, 1, K, stride=1, padding=K//2, bias=False).
# --------------------------------------------------------------------------
def _build_conv_matrices(w_sp, H, W, K):
    p = K // 2
    HW = H * W
    wt = w_sp.reshape(2, K, K).astype(jnp.float32)
    r = jnp.arange(H)
    c = jnp.arange(W)
    kh = r[:, None] - r[None, :] + p                     # (H_src, H_out)
    kw = c[:, None] - c[None, :] + p                     # (W_src, W_out)
    vh = (kh >= 0) & (kh < K)
    vw = (kw >= 0) & (kw < K)
    kh_c = jnp.clip(kh, 0, K - 1)
    kw_c = jnp.clip(kw, 0, K - 1)
    m = wt[:, kh_c[:, :, None, None], kw_c[None, None, :, :]]   # (2,Hs,Ho,Ws,Wo)
    mask = (vh[:, :, None, None] & vw[None, None, :, :])[None]
    m = jnp.where(mask, m, 0.0)
    m = jnp.transpose(m, (0, 1, 3, 2, 4)).reshape(2, HW, HW)    # (2, src, out)
    return m[0], m[1]


def _pick_batch_block(N, C, HW, itemsize, max_bytes=8 * 1024 * 1024, max_nb=8):
    """Largest divisor of N whose per-block working set fits the budget while
    keeping >= 2 grid steps when possible (both v7x TensorCores get work)."""
    best = 1
    per_b = C * HW * (itemsize + 12)        # stored block + f32 working copies
    for nb in range(1, min(N, max_nb) + 1):
        if N % nb:
            continue
        if nb * per_b > max_bytes:
            break
        if N // nb >= 2 or N == 1:
            best = nb
    return best


# --------------------------------------------------------------------------
# Fused CBAM kernel: one grid step = Nb batch elements, fully vectorized.
# --------------------------------------------------------------------------
def _cbam_fused_kernel(x_ref, w1_ref, w2_ref, cmean_ref, cmax_ref, y_ref, *, Nb):
    x = x_ref[...].astype(jnp.float32)                        # (Nb, C, HW)

    # ---------------- channel attention ----------------
    avg_ck = jnp.mean(x, axis=-1, keepdims=True)              # (Nb, C, 1)
    max_ck = jnp.max(x, axis=-1, keepdims=True)               # (Nb, C, 1)
    # Register-resident (C, 2*Nb) pooled matrix: columns [avg_0..avg_Nb-1 | max_...]
    pooled = jnp.concatenate([avg_ck[b] for b in range(Nb)]
                             + [max_ck[b] for b in range(Nb)], axis=-1)   # (C, 2Nb)

    # shared MLP: one batched MXU pass for all pooled columns
    hid = jnp.maximum(
        jnp.dot(w1_ref[...], pooled, preferred_element_type=jnp.float32), 0.0)
    z = jnp.dot(w2_ref[...], hid, preferred_element_type=jnp.float32)     # (C, 2Nb)
    ca = jax.nn.sigmoid(z[:, :Nb] + z[:, Nb:])                            # (C, Nb)
    # back to (Nb, C, 1): each column becomes one batch tile (layout-trivial)
    ca_b = jnp.stack([ca[:, b:b + 1] for b in range(Nb)], axis=0)         # (Nb, C, 1)

    out1 = x * ca_b                                                       # (Nb, C, HW)

    # ---------------- spatial attention: one batched matmul ----------------
    mean_m = jnp.mean(out1, axis=1, keepdims=True)            # (Nb, 1, HW)
    max_m = jnp.max(out1, axis=1, keepdims=True)              # (Nb, 1, HW)
    mean2 = jnp.concatenate([mean_m[b] for b in range(Nb)], axis=0)       # (Nb, HW)
    max2 = jnp.concatenate([max_m[b] for b in range(Nb)], axis=0)         # (Nb, HW)

    logits = (jnp.dot(mean2, cmean_ref[...], preferred_element_type=jnp.float32)
              + jnp.dot(max2, cmax_ref[...], preferred_element_type=jnp.float32))
    sa = jax.nn.sigmoid(logits)                                           # (Nb, HW)
    sa_b = jnp.stack([sa[b:b + 1] for b in range(Nb)], axis=0)            # (Nb, 1, HW)

    # one full-lane, full-block store
    y_ref[...] = (out1 * sa_b).astype(y_ref.dtype)


# --------------------------------------------------------------------------
# Wrapper
# --------------------------------------------------------------------------
def cbam_forward(x, w1, w2, w_sp, spatial_kernel=7):
    N, C, H, W = x.shape
    Cr = w1.shape[0]
    HW = H * W
    K = spatial_kernel
    itemsize = jnp.dtype(x.dtype).itemsize

    # dense conv-matrix path only for small spatial sizes (2*HW*HW f32)
    assert 2 * HW * HW * 4 <= 16 * 1024 * 1024, "spatial size too large for dense conv path"

    Nb = _pick_batch_block(N, C, HW, itemsize)
    x_flat = x.reshape(N, C, HW)                    # lane-dense: HW on the lane axis
    cmean, cmax = _build_conv_matrices(w_sp, H, W, K)   # (HW, HW) each, f32

    blk_work = Nb * C * HW * (itemsize + 12)
    conv_bytes = 2 * HW * HW * 4
    vmem_limit = int(min(48 << 20, max(32 << 20, 4 * blk_work + conv_bytes + (4 << 20))))

    kern = functools.partial(_cbam_fused_kernel, Nb=Nb)
    y_flat = pl.pallas_call(
        kern,
        out_shape=jax.ShapeDtypeStruct((N, C, HW), x.dtype),
        grid=(N // Nb,),
        in_specs=[
            pl.BlockSpec((Nb, C, HW), lambda i: (i, 0, 0)),
            pl.BlockSpec((Cr, C), lambda i: (0, 0)),
            pl.BlockSpec((C, Cr), lambda i: (0, 0)),
            pl.BlockSpec((HW, HW), lambda i: (0, 0)),
            pl.BlockSpec((HW, HW), lambda i: (0, 0)),
        ],
        out_specs=pl.BlockSpec((Nb, C, HW), lambda i: (i, 0, 0)),
        compiler_params=pltpu.CompilerParams(
            dimension_semantics=("parallel",),
            vmem_limit_bytes=vmem_limit,
        ),
    )(x_flat, w1.astype(jnp.float32), w2.astype(jnp.float32), cmean, cmax)
    return y_flat.reshape(N, C, H, W)


# --------------------------------------------------------------------------
# Pure-JAX reference (mirrors the PyTorch forward exactly)
# --------------------------------------------------------------------------
def cbam_reference(x, w1, w2, w_sp):
    avg = jnp.mean(x, axis=(2, 3), keepdims=True)
    mx = jnp.max(x, axis=(2, 3), keepdims=True)

    def mlp(v):                                     # v: (N, C, 1, 1)
        v2 = v[:, :, 0, 0]
        h = jnp.maximum(v2 @ w1.T, 0.0)
        return (h @ w2.T)[:, :, None, None]

    ca = jax.nn.sigmoid(mlp(avg) + mlp(mx))
    out1 = ca * x

    avgm = jnp.mean(out1, axis=1, keepdims=True)
    maxm = jnp.max(out1, axis=1, keepdims=True)
    cat = jnp.concatenate([avgm, maxm], axis=1)
    conv = jax.lax.conv_general_dilated(
        cat, w_sp, window_strides=(1, 1), padding=((3, 3), (3, 3)),
        dimension_numbers=("NCHW", "OIHW", "NCHW"))
    sa = jax.nn.sigmoid(conv)
    return sa * out1


if __name__ == "__main__":
    # channel must be >= ratio (16) for the PyTorch module to be valid
    N, C, H, W = 2, 32, 16, 16
    ratio, K = 16, 7
    Cr = C // ratio

    key = jax.random.PRNGKey(0)
    k1, k2, k3, kx = jax.random.split(key, 4)
    w1 = jax.random.normal(k1, (Cr, C), jnp.float32) * 0.2         # 1x1 conv C->C/r
    w2 = jax.random.normal(k2, (C, Cr), jnp.float32) * 0.2         # 1x1 conv C/r->C
    w_sp = jax.random.normal(k3, (1, 2, K, K), jnp.float32) * 0.1  # 7x7 conv 2->1
    x = jax.random.normal(kx, (N, C, H, W), jnp.float32)

    y = cbam_forward(x, w1, w2, w_sp, spatial_kernel=K)
    y = jax.block_until_ready(y)

    y_ref = cbam_reference(x, w1, w2, w_sp)
    np.testing.assert_allclose(np.asarray(y), np.asarray(y_ref),
                               rtol=2e-4, atol=2e-4)
    print("KERNEL_OK")
</pallas_src>

<mosaic_0001>
module attributes {stable_mosaic.version = 11 : i64} {
  func.func @_cbam_fused_kernel(%arg0: i32, %arg1: memref<1x32x256xf32, #tpu.memory_space<vmem>>, %arg2: memref<2x32xf32, #tpu.memory_space<vmem>>, %arg3: memref<32x2xf32, #tpu.memory_space<vmem>>, %arg4: memref<256x256xf32, #tpu.memory_space<vmem>>, %arg5: memref<256x256xf32, #tpu.memory_space<vmem>>, %arg6: memref<1x32x256xf32, #tpu.memory_space<vmem>>) attributes {dimension_semantics = [#tpu.dimension_semantics<parallel>], iteration_bounds = array<i64: 2>, scalar_prefetch = 0 : i64, scratch_operands = 0 : i64, tpu.core_type = #tpu.core_type<tc>, window_params = [{transform_indices = @transform_0, window_bounds = array<i64: 1, 32, 256>}, {pipeline_mode = #tpu.pipeline_mode<synchronous>, transform_indices = @transform_1, window_bounds = array<i64: 2, 32>}, {pipeline_mode = #tpu.pipeline_mode<synchronous>, transform_indices = @transform_2, window_bounds = array<i64: 32, 2>}, {pipeline_mode = #tpu.pipeline_mode<synchronous>, transform_indices = @transform_3, window_bounds = array<i64: 256, 256>}, {pipeline_mode = #tpu.pipeline_mode<synchronous>, transform_indices = @transform_4, window_bounds = array<i64: 256, 256>}, {transform_indices = @transform_5, window_bounds = array<i64: 1, 32, 256>}]} {
    %c0 = arith.constant 0 : index
    %c0_0 = arith.constant 0 : index
    %c0_1 = arith.constant 0 : index
    %0 = vector.load %arg1[%c0, %c0_0, %c0_1] : memref<1x32x256xf32, #tpu.memory_space<vmem>>, vector<1x32x256xf32>
    %cst = arith.constant dense<0.000000e+00> : vector<1x32xf32>
    %1 = vector.multi_reduction <add>, %0, %cst [2] : vector<1x32x256xf32> to vector<1x32xf32>
    %2 = vector.shape_cast %1 : vector<1x32xf32> to vector<1x32x1xf32>
    %cst_2 = arith.constant 2.560000e+02 : f32
    %3 = vector.broadcast %cst_2 : f32 to vector<1x32x1xf32>
    %4 = arith.divf %2, %3 : vector<1x32x1xf32>
    %cst_3 = arith.constant dense<0xFF800000> : vector<1x32xf32>
    %5 = vector.multi_reduction <maximumf>, %0, %cst_3 [2] : vector<1x32x256xf32> to vector<1x32xf32>
    %6 = vector.shape_cast %5 : vector<1x32xf32> to vector<1x32x1xf32>
    %7 = vector.shape_cast %4 : vector<1x32x1xf32> to vector<32x1xf32>
    %8 = vector.shape_cast %6 : vector<1x32x1xf32> to vector<32x1xf32>
    %9 = tpu.concatenate %7, %8 in 1 : vector<32x1xf32>, vector<32x1xf32> -> vector<32x2xf32>
    %c0_4 = arith.constant 0 : index
    %c0_5 = arith.constant 0 : index
    %10 = vector.load %arg2[%c0_4, %c0_5] : memref<2x32xf32, #tpu.memory_space<vmem>>, vector<2x32xf32>
    %cst_6 = arith.constant dense<0.000000e+00> : vector<2x2xf32>
    %11 = tpu.matmul %10, %9, %cst_6 {dimension_numbers = #tpu.dot_dimension_numbers<[1], [0], [0], [1], [0, 0, 1, 1], [], []>} : vector<2x32xf32>, vector<32x2xf32>, vector<2x2xf32> -> vector<2x2xf32>
    %cst_7 = arith.constant 0.000000e+00 : f32
    %12 = vector.broadcast %cst_7 : f32 to vector<2x2xf32>
    %13 = arith.maximumf %11, %12 : vector<2x2xf32>
    %c0_8 = arith.constant 0 : index
    %c0_9 = arith.constant 0 : index
    %14 = vector.load %arg3[%c0_8, %c0_9] : memref<32x2xf32, #tpu.memory_space<vmem>>, vector<32x2xf32>
    %cst_10 = arith.constant dense<0.000000e+00> : vector<32x2xf32>
    %15 = tpu.matmul %14, %13, %cst_10 {dimension_numbers = #tpu.dot_dimension_numbers<[1], [0], [0], [1], [0, 0, 1, 1], [], []>} : vector<32x2xf32>, vector<2x2xf32>, vector<32x2xf32> -> vector<32x2xf32>
    %16 = vector.extract_strided_slice %15 {offsets = [0, 0], sizes = [32, 1], strides = [1, 1]} : vector<32x2xf32> to vector<32x1xf32>
    %17 = vector.extract_strided_slice %15 {offsets = [0, 1], sizes = [32, 1], strides = [1, 1]} : vector<32x2xf32> to vector<32x1xf32>
    %18 = arith.addf %16, %17 : vector<32x1xf32>
    %19 = arith.negf %18 : vector<32x1xf32>
    %20 = math.exp %19 : vector<32x1xf32>
    %cst_11 = arith.constant 1.000000e+00 : f32
    %21 = vector.broadcast %cst_11 : f32 to vector<32x1xf32>
    %22 = arith.addf %21, %20 : vector<32x1xf32>
    %23 = arith.divf %21, %22 : vector<32x1xf32>
    %24 = vector.shape_cast %23 : vector<32x1xf32> to vector<1x32x1xf32>
    %25 = vector.broadcast %24 : vector<1x32x1xf32> to vector<1x32x256xf32>
    %26 = arith.mulf %0, %25 : vector<1x32x256xf32>
    %cst_12 = arith.constant dense<0.000000e+00> : vector<1x256xf32>
    %27 = vector.multi_reduction <add>, %26, %cst_12 [1] : vector<1x32x256xf32> to vector<1x256xf32>
    %28 = vector.shape_cast %27 : vector<1x256xf32> to vector<1x1x256xf32>
    %cst_13 = arith.constant 3.200000e+01 : f32
    %29 = vector.broadcast %cst_13 : f32 to vector<1x1x256xf32>
    %30 = arith.divf %28, %29 : vector<1x1x256xf32>
    %cst_14 = arith.constant dense<0xFF800000> : vector<1x256xf32>
    %31 = vector.multi_reduction <maximumf>, %26, %cst_14 [1] : vector<1x32x256xf32> to vector<1x256xf32>
    %32 = vector.shape_cast %31 : vector<1x256xf32> to vector<1x1x256xf32>
    %33 = vector.shape_cast %30 : vector<1x1x256xf32> to vector<1x256xf32>
    %34 = vector.shape_cast %32 : vector<1x1x256xf32> to vector<1x256xf32>
    %c0_15 = arith.constant 0 : index
    %c0_16 = arith.constant 0 : index
    %35 = vector.load %arg4[%c0_15, %c0_16] : memref<256x256xf32, #tpu.memory_space<vmem>>, vector<256x256xf32>
    %cst_17 = arith.constant dense<0.000000e+00> : vector<1x256xf32>
    %36 = tpu.matmul %33, %35, %cst_17 {dimension_numbers = #tpu.dot_dimension_numbers<[1], [0], [0], [1], [0, 0, 1, 1], [], []>} : vector<1x256xf32>, vector<256x256xf32>, vector<1x256xf32> -> vector<1x256xf32>
    %c0_18 = arith.constant 0 : index
    %c0_19 = arith.constant 0 : index
    %37 = vector.load %arg5[%c0_18, %c0_19] : memref<256x256xf32, #tpu.memory_space<vmem>>, vector<256x256xf32>
    %cst_20 = arith.constant dense<0.000000e+00> : vector<1x256xf32>
    %38 = tpu.matmul %34, %37, %cst_20 {dimension_numbers = #tpu.dot_dimension_numbers<[1], [0], [0], [1], [0, 0, 1, 1], [], []>} : vector<1x256xf32>, vector<256x256xf32>, vector<1x256xf32> -> vector<1x256xf32>
    %39 = arith.addf %36, %38 : vector<1x256xf32>
    %40 = arith.negf %39 : vector<1x256xf32>
    %41 = math.exp %40 : vector<1x256xf32>
    %cst_21 = arith.constant 1.000000e+00 : f32
    %42 = vector.broadcast %cst_21 : f32 to vector<1x256xf32>
    %43 = arith.addf %42, %41 : vector<1x256xf32>
    %44 = arith.divf %42, %43 : vector<1x256xf32>
    %45 = vector.shape_cast %44 : vector<1x256xf32> to vector<1x1x256xf32>
    %46 = vector.broadcast %45 : vector<1x1x256xf32> to vector<1x32x256xf32>
    %47 = arith.mulf %26, %46 : vector<1x32x256xf32>
    %c0_22 = arith.constant 0 : index
    %c0_23 = arith.constant 0 : index
    %c0_24 = arith.constant 0 : index
    %48 = vector.load %arg6[%c0_22, %c0_23, %c0_24] : memref<1x32x256xf32, #tpu.memory_space<vmem>>, vector<1x32x256xf32>
    tpu.vector_store %arg6[%c0_22, %c0_23, %c0_24], %47 {strides = array<i32>} : memref<1x32x256xf32, #tpu.memory_space<vmem>>, vector<1x32x256xf32>,
    return
  }
  func.func @transform_0(%arg0: i32) -> (i32, i32, i32) {
    %c0_i32 = arith.constant 0 : i32
    %c0_i32_0 = arith.constant 0 : i32
    %c0_i32_1 = arith.constant 0 : i32
    return %arg0, %c0_i32, %c0_i32_0 : i32, i32, i32
  }
  func.func @transform_1(%arg0: i32) -> (i32, i32) {
    %c0_i32 = arith.constant 0 : i32
    %c0_i32_0 = arith.constant 0 : i32
    %c0_i32_1 = arith.constant 0 : i32
    return %c0_i32, %c0_i32_0 : i32, i32
  }
  func.func @transform_2(%arg0: i32) -> (i32, i32) {
    %c0_i32 = arith.constant 0 : i32
    %c0_i32_0 = arith.constant 0 : i32
    %c0_i32_1 = arith.constant 0 : i32
    return %c0_i32, %c0_i32_0 : i32, i32
  }
  func.func @transform_3(%arg0: i32) -> (i32, i32) {
    %c0_i32 = arith.constant 0 : i32
    %c0_i32_0 = arith.constant 0 : i32
    %c0_i32_1 = arith.constant 0 : i32
    return %c0_i32, %c0_i32_0 : i32, i32
  }
  func.func @transform_4(%arg0: i32) -> (i32, i32) {
    %c0_i32 = arith.constant 0 : i32
    %c0_i32_0 = arith.constant 0 : i32
    %c0_i32_1 = arith.constant 0 : i32
    return %c0_i32, %c0_i32_0 : i32, i32
  }
  func.func @transform_5(%arg0: i32) -> (i32, i32, i32) {
    %c0_i32 = arith.constant 0 : i32
    %c0_i32_0 = arith.constant 0 : i32
    %c0_i32_1 = arith.constant 0 : i32
    return %arg0, %c0_i32, %c0_i32_0 : i32, i32, i32
  }
}

</mosaic_0001>

<bundles_post_ra>
// kernel: tpu_custom_call.1
= control target key start
LH: loop header
LB: loop body
LE: loop exit
PB: predicated region body
PF: predicated region fallthrough
CT: control target
= control target key end

     0   :  { %10 = vsyncpa [#allocation3], 0  ;;  %s1877_s0 = inlined_call_operand.hbm [shape: f32[2,32,256], index: 0, kind: input, shape index: {}]   ;;  %s1878_s1 = inlined_call_operand.vmem [shape: f32[2,32], index: 1, kind: input, shape index: {}]   ;;  %s1879_s2 = inlined_call_operand.vmem [shape: f32[32,2], index: 2, kind: input, shape index: {}]   ;;  %s1880_s3 = inlined_call_operand.hbm [shape: f32[256,256], index: 3, kind: input, shape index: {}]   ;;  %s1881_s4 = inlined_call_operand.hbm [shape: f32[256,256], index: 4, kind: input, shape index: {}]   ;;  %s1882_s5 = inlined_call_operand.hbm [shape: f32[2,32,256], index: 5, kind: output, shape index: {}]  }
   0x1   :  { %12 = vsyncpa [#allocation3 + $0x1], 0 }
   0x2   :  { %13 = vsyncpa [#allocation6], 0 }
   0x3   :  { %14 = vsyncpa [#allocation4], 0 }
   0x4   :  { %16 = vsyncpa [#allocation4 + $0x1], 0  ;;  %s1519_s18 = smov 0   ;;  %s1521_s19 = smov 0  }
   0x5   :  { %s1523_s20 = smov 0   ;;  %s1525_s21 = smov 0  }
   0x6 LB: > { %s1540_s22 = sadd.s32 4294967295, %s1474_s21   ;;  %s1019_s23 = sadd.s32 4294967294, %s1474_s21   ;;  %s1474_s21 = sphi %s1525_s21, %s1902_s21   ;;  %s1470_s20 = sphi %s1523_s20, %s1901_s20   ;;  %s1466_s19 = sphi %s1521_s19, %s1900_s19   ;;  %s1462_s18 = sphi %s1519_s18, %s1899_s18  }
   0x7   : > { %p42_p0 = scmp.ne.s32.totalorder %s1466_s19, %s1462_s18  ;;  %p1883_p1 = scmp.eq.s32.totalorder %s1540_s22, 0 }
   0x8   : > { %p156_p3 = scmp.eq.s32.totalorder %s1019_s23, 1  ;;  %p1020_p5 = scmp.ge.s32.totalorder %s1474_s21, 1 }
   0x9   : > { %p1549_p4 = por %p1883_p1, %p42_p0  ;;  %p163_p7 = scmp.lt.s32.totalorder %s1474_s21, 3 }
   0xa   : > { %p1554_p6 = por %p156_p3, %p42_p0  ;;  %s1476_s27 = smov [#allocation5]  }
   0xb   : > { %s1886_s24 = scalar_select %p1549_p4, 1, 0 }
   0xc   : > { %s1887_s25 = scalar_select %p1554_p6, 1, 0 }
   0xd   : > { %p1559_p8 = pnand %p1020_p5, %p163_p7  ;;  %s181_s28 = sshll.u32 %s1476_s27, 4  ;;  %s1563_s28 = int_to_ptr.vmem [resolvable:$true] %s181_s28 }
   0xe   : > { %s1477_s30 = smov [#allocation7]   ;;  %s1318_s9 = scalar_lea.hbm %s1880_s3, 8192 }
   0xf   : > { %p1228_p9 = pneg %p1559_p8  ;;  %s194_s6 = sshll.u32 %s1477_s30, 4  ;;  %s1574_s6 = int_to_ptr.vmem [resolvable:$true] %s194_s6 }
  0x10   : > { %p1319_p12 = scmp.ne.s32.totalorder %s1880_s3, %s1318_s9  ;;  %p1325_p5 = scmp.lt.u32.totalorder %s1318_s9, %s1880_s3 }
  0x11   : > { %p1570_p11 = pnand %p1228_p9, %p1883_p1 }
  0x13   : > { %p1320_p13 = pneg %p1570_p11 }
  0x15   : > { %p1321_p0 = pnand %p1320_p13, %p1319_p12 }
  0x17   : > { %p1322_p3 = pneg %p1321_p0 }
  0x19   : > { %p1327_p7 = pnand %p1325_p5, %p1322_p3 }
  0x1b   : > { %1330 = shalt.err (!%p1327_p7)
}
  0x1c   : > { %s1331_s14 = scalar_lea.vmem %s1563_s28, 8192  ;;  %p1339_p2 = scmp.lt.s32.totalorder %s1563_s28, %s1563_s28 }
  0x1d   : > { %p1332_p9 = scmp.ne.s32.totalorder %s1563_s28, %s1331_s14  ;;  %p1340_p12 = scmp.lt.s32.totalorder %s1331_s14, %s1331_s14 }
  0x1f   : > { %p1334_p10 = pnand %p1332_p9, %p1320_p13  ;;  %p1341_p0 = por %p1340_p12, %p1339_p2 }
  0x21   : > { %p1335_p1 = pneg %p1334_p10 }
  0x23   : > { %p1342_p6 = pnand %p1341_p0, %p1335_p1 }
  0x25   : > { %1345 = shalt.err (!%p1342_p6)
}
  0x26   : > { %s1478_s15 = smov 256   ;;  %s1479_s16 = smov 16  }
  0x27   : > { %1231 = dma.hbm_to_vmem [thread:$0]  (!%p1570_p11), %s1880_s3, 8192, %s1563_s28, [#allocation6], %s1478_s15, %s1478_s15, %s1479_s16  }
  0x28   : > { %s1346_s7 = scalar_lea.hbm %s1881_s4, 8192 }
  0x29   : > { %p1347_p1 = scmp.ne.s32.totalorder %s1881_s4, %s1346_s7  ;;  %p1353_p10 = scmp.lt.u32.totalorder %s1346_s7, %s1881_s4 }
  0x2b   : > { %p1349_p2 = pnand %p1347_p1, %p1320_p13 }
  0x2d   : > { %p1350_p6 = pneg %p1349_p2 }
  0x2f   : > { %p1355_p3 = pnand %p1353_p10, %p1350_p6 }
  0x31   : > { %1358 = shalt.err (!%p1355_p3)
}
  0x32   : > { %s1359_s28 = scalar_lea.vmem %s1574_s6, 8192  ;;  %p1367_p12 = scmp.lt.s32.totalorder %s1574_s6, %s1574_s6 }
  0x33   : > { %p1360_p5 = scmp.ne.s32.totalorder %s1574_s6, %s1359_s28  ;;  %p1368_p0 = scmp.lt.s32.totalorder %s1359_s28, %s1359_s28 }
  0x35   : > { %p1362_p7 = pnand %p1360_p5, %p1320_p13  ;;  %p1369_p1 = por %p1368_p0, %p1367_p12 }
  0x37   : > { %p1363_p9 = pneg %p1362_p7 }
  0x39   : > { %p1370_p2 = pnand %p1369_p1, %p1363_p9 }
  0x3b   : > { %1373 = shalt.err (!%p1370_p2)
}
  0x3c   : > { %1234 = dma.hbm_to_vmem [thread:$0]  (!%p1570_p11), %s1881_s4, 8192, %s1574_s6, [#allocation6], %s1478_s15, %s1478_s15, %s1479_s16  }
  0x3d   : > { %s1635_s29 = sadd.s32 1, %s1474_s21   ;;  %s29_s14 = sadd.s32 1, %s1470_s20 }
  0x3e   : > { %s26_s17 = ssub.s32 %s1474_s21, %s1635_s29  ;;  %p36_p13 = scmp.ne.s32.totalorder %s1470_s20, %s1466_s19 }
  0x3f   : > { %p27_p6 = scmp.eq.s32.totalorder %s26_s17, 0  ;;  %p37_p10 = scmp.eq.s32.totalorder %s1474_s21, 0 }
  0x40   : > { %p1890_p3 = scmp.eq.s32.totalorder %s1540_s22, 1  ;;  %p1245_p7 = scmp.lt.s32.totalorder %s1474_s21, 2 }
  0x41   : > { %s1651_s27 = scalar_select %p27_p6, %s1470_s20, %s29_s14  }
  0x42   : > { %p1645_p5 = por %p1890_p3, %p36_p13  ;;  %p38_p9 = por %p37_p10, %p36_p13 }
  0x43   : > { %s208_s30 = sand.u32 1, %s1470_s20   ;;  %s1049_s6 = sshll.u32 %s1474_s21, 10 }
  0x44   : > { %s1891_s23 = scalar_select %p1645_p5, 1, 0 }
  0x45   : > { %s1024_s7 = sshll.u32 %s208_s30, 6  ;;  %s1658_s10 = scalar_lea.hbm %s1877_s0, %s1049_s6 }
  0x46   : > { %s212_s11 = scalar_lea.vmem [#allocation2], %s1024_s7  ;;  %p1662_p11 = pnand %p1245_p7, %p38_p9 }
  0x47   : > { %s219_s28 = sshll.u32 %s212_s11, 4  ;;  %s1666_s13 = scalar_lea.sflag [#allocation3], %s208_s30  ;;  %s1660_s28 = int_to_ptr.vmem [resolvable:$true] %s219_s28 }
  0x48   : > { %s1374_s14 = scalar_lea.hbm %s1658_s10, 1024  ;;  %p1376_p0 = pneg %p1662_p11 }
  0x49   : > { %p1375_p12 = scmp.ne.s32.totalorder %s1658_s10, %s1374_s14  ;;  %s1379_s6 = scalar_lea.hbm %s1877_s0, 2048 }
  0x4a   : > { %p1380_p13 = scmp.lt.u32.totalorder %s1658_s10, %s1877_s0  ;;  %p1381_p6 = scmp.lt.u32.totalorder %s1379_s6, %s1374_s14 }
  0x4b   : > { %p1377_p1 = pnand %p1376_p0, %p1375_p12  ;;  %p1383_p3 = scmp.lt.u32.totalorder %s1374_s14, %s1658_s10 }
  0x4c   : > { %p1382_p10 = por %p1381_p6, %p1380_p13 }
  0x4d   : > { %p1378_p2 = pneg %p1377_p1 }
  0x4e   : > { %p1384_p7 = por %p1383_p3, %p1382_p10 }
  0x50   : > { %p1385_p9 = pnand %p1384_p7, %p1378_p2 }
  0x52   : > { %1388 = shalt.err (!%p1385_p9)
}
  0x53   : > { %s1389_s30 = scalar_lea.vmem %s1660_s28, 1024  ;;  %s1480_s11 = smov [#allocation2]  }
  0x54   : > { %p1390_p12 = scmp.ne.s32.totalorder %s1660_s28, %s1389_s30  ;;  %s1394_s17 = sshll.u32 %s1480_s11, 4  ;;  %s1395_s17 = int_to_ptr.vmem [resolvable:$false] %s1394_s17 }
  0x55   : > { %s1396_s7 = scalar_lea.vmem %s1395_s17, 2048  ;;  %p1397_p4 = scmp.lt.s32.totalorder %s1660_s28, %s1395_s17 }
  0x56   : > { %p1392_p1 = pnand %p1390_p12, %p1376_p0  ;;  %p1398_p13 = scmp.lt.s32.totalorder %s1396_s7, %s1389_s30 }
  0x58   : > { %p1393_p5 = pneg %p1392_p1  ;;  %p1399_p6 = por %p1398_p13, %p1397_p4 }
  0x5a   : > { %p1400_p10 = pnand %p1399_p6, %p1393_p5 }
  0x5c   : > { %1403 = shalt.err (!%p1400_p10)
}
  0x5d   : > { %1238 = dma.hbm_to_vmem [thread:$0]  (!%p1662_p11), %s1658_s10, 1024, %s1660_s28, %s1666_s13, %s1478_s15, %s1478_s15, %s1479_s16  }
  0x5e   : > { %231 = sbr.rel (%p1559_p8) target bundleno = 1257 (0x4e9), region = 40  ;;  %s1700_s14 = sand.u32 (!%p1559_p8), 1, %s1466_s19  }
  0x5f   : > { %s1028_s6 = sshll.u32 (!%p1559_p8), %s1700_s14, 6  ;;  %s234_s8 = scalar_lea.sflag (!%p1559_p8), [#allocation3], %s1700_s14 }
  0x60   : > { %s237_s12 = scalar_lea.vmem (!%p1559_p8), [#allocation2], %s1028_s6  ;;  %p1893_p4 = scmp.ne.s32.totalorder (!%p1559_p8), %s1886_s24, 0 }
  0x65   : > { %1449 = dma.done.wait (%p1893_p4), %s234_s8, 1024  }
  0x66   : > { %1451 = vsyncadd (%p1893_p4), %s234_s8, 4294966272  ;;  %p1894_p5 = scmp.eq.s32.totalorder %s1540_s22, 0 }
  0x68   : > { %1453 = dma.done.wait (%p1894_p5), [#allocation6], 16384   ;;  %p1895_p8 = pmov %p1894_p5 }
  0x69   : > { %v1714_v0 = vld [vmem:[%s237_s12] sm:$0xff]  ;;  %v1716_v1 = vld [vmem:[%s237_s12 + $0x8] sm:$0xff]  ;;  %v1718_v2 = vld [vmem:[%s237_s12 + $0x10] sm:$0xff]  ;;  %v1481_v16 = vmov 0.0|0.0   ;;  %vm1482_vm0 = vmmov 0   ;;  %v1483_v17 = vmov 0.0  }
  0x6a   : > { %1455 = vsyncadd (%p1895_p8), [#allocation6], 4294950912  ;;  %v297_v3 = vmax.f32 %v1714_v0, %v1716_v1  ;;  %v280_v4 = vadd.f32 %v1716_v1, %v1714_v0  ;;  %v1724_v5 = vld [vmem:[%s237_s12 + $0x18] sm:$0xff]  ;;  %v1730_v8 = vld [vmem:[%s237_s12 + $0x30] sm:$0xff]  ;;  %1080 = vmatprep.subr.bf16.mxu0 %v1481_v16  ;;  %1069 = vmatprep.mubr.msk.f32.mxu0 %vm1482_vm0, %v1483_v17  ;;  %vm309_vm1 = vcmask 7168   ;;  %vm315_vm2 = vcmask 261120  }
  0x6b   : > { %v300_v6 = vmax.f32 %v1718_v2, %v1724_v5  ;;  %v283_v7 = vadd.f32 %v1724_v5, %v1718_v2  ;;  %v1732_v9 = vld [vmem:[%s237_s12 + $0x38] sm:$0xff]  ;;  %v1734_v10 = vld [vmem:[%s237_s12 + $0x20] sm:$0xff]  ;;  %v1736_v11 = vld [vmem:[%s237_s12 + $0x28] sm:$0xff]  ;;  %vm394_vm3 = vcmask 15360   ;;  %vm407_vm4 = vcmask 1041408   ;;  %s1484_s17 = smov 127  }
  0x6c   : > { %298 = vmax.xlane.f32.xlu1 %v297_v3  ;;  %281 = vadd.xlane.f32.xlu0 %v280_v4  ;;  %v289_v12 = vadd.f32 %v1732_v9, %v1730_v8  ;;  %v286_v13 = vadd.f32 %v1736_v11, %v1734_v10  ;;  %v306_v14 = vmax.f32 %v1730_v8, %v1732_v9  ;;  %v314_v36 = vld [vmem:[%s1878_s1] sm:$0x3]  ;;  %v391_v41 = vld [vmem:[%s1879_s2 + $0x8] sm:$0xff]  ;;  %v392_v42 = vld [vmem:[%s1879_s2 + $0x10] sm:$0xff]  ;;  %v1485_v48 = vmov 0   ;;  %s1050_s7 = sshll.u32 %s1540_s22, 10 }
  0x6d   : > { %v303_v15 = vmax.f32 %v1734_v10, %v1736_v11  ;;  %v390_v37 = vld [vmem:[%s1879_s2] sm:$0xff]  ;;  %v393_v43 = vld [vmem:[%s1879_s2 + $0x18] sm:$0xff]  ;;  %1292 = vset.pattern.permute.xlu1 %v1485_v48  ;;  %1293 = vset.pattern.permute.xlu0 %v1485_v48  ;;  %v672_v49 = vld [vmem:[#allocation7 + $0x8] sm:$0xff]  ;;  %s271_s8 = scalar_lea.vmem [#allocation8], %s1028_s6  ;;  %s1827_s15 = scalar_lea.hbm %s1882_s5, %s1050_s7 }
  0x6e   : > { %1074 = vmatprep.mubr.msk.f32.mxu1 %vm394_vm3, %v390_v37  ;;  %v674_v50 = vld [vmem:[#allocation7 + $0x18] sm:$0xff]  ;;  %v608_v51 = vld [vmem:[#allocation5 + $0x8] sm:$0xff]  ;;  %v671_v54 = vld [vmem:[#allocation7] sm:$0xff]  ;;  %s927_s12 = sshll.u32 %s271_s8, 4  ;;  %s914_s22 = scalar_lea.sflag [#allocation4], %s1700_s14  ;;  %s1829_s12 = int_to_ptr.vmem [resolvable:$true] %s927_s12 }
  0x6f   : > { %v1086_v52 = vpack.c.bf16 %v674_v50, %v672_v49  ;;  %v610_v53 = vld [vmem:[#allocation5 + $0x18] sm:$0xff]  ;;  %v673_v55 = vld [vmem:[#allocation7 + $0x10] sm:$0xff]  ;;  %v607_v58 = vld [vmem:[#allocation5] sm:$0xff]  ;;  %s1404_s6 = scalar_lea.vmem %s1829_s12, 1024  ;;  %p1896_p0 = scmp.ne.s32.totalorder %s1891_s23, 0 }
  0x70   : > { %301 = vmax.xlane.f32.xlu1 %v300_v6  ;;  %284 = vadd.xlane.f32.xlu0 %v283_v7  ;;  %v1150_v56 = vpack.c.bf16 %v610_v53, %v608_v51  ;;  %v1088_v57 = vpack.c.bf16 %v673_v55, %v671_v54  ;;  %v609_v59 = vld [vmem:[#allocation5 + $0x10] sm:$0xff]  ;;  %v676_v60 = vld [vmem:[#allocation7 + $0x28] sm:$0xff]  ;;  %v678_v62 = vld [vmem:[#allocation7 + $0x38] sm:$0xff]  ;;  %p1405_p11 = scmp.ne.s32.totalorder %s1829_s12, %s1404_s6  ;;  %s1486_s16 = smov [#allocation8]  }
  0x71   : > { %v1152_v61 = vpack.c.bf16 %v609_v59, %v607_v58  ;;  %v612_v63 = vld [vmem:[#allocation5 + $0x28] sm:$0xff]  ;;  %v614_v3 = vld [vmem:[#allocation5 + $0x38] sm:$0xff]  ;;  %v1090_v4 = vpack.c.bf16 %v678_v62, %v676_v60  ;;  %v675_v7 = vld [vmem:[#allocation7 + $0x20] sm:$0xff]  ;;  %s1408_s10 = sshll.u32 %s1486_s16, 4  ;;  %s1409_s10 = int_to_ptr.vmem [resolvable:$false] %s1408_s10 }
  0x72   : > { %v1154_v6 = vpack.c.bf16 %v614_v3, %v612_v63  ;;  %v682_v17 = vld [vmem:[#allocation7 + $0x58] sm:$0xff]  ;;  %v619_v37 = vld [vmem:[#allocation5 + $0x60] sm:$0xff]  ;;  %v689_v51 = vld [vmem:[#allocation7 + $0x90] sm:$0xff]  ;;  %p1406_p2 = pnand %p1405_p11, %p1896_p0  ;;  %s1410_s28 = scalar_lea.vmem %s1409_s10, 2048 }
  0x73   : > { %v687_v50 = vld [vmem:[#allocation7 + $0x80] sm:$0xff]  ;;  %v625_v54 = vld [vmem:[#allocation5 + $0x90] sm:$0xff]  ;;  %v692_v55 = vld [vmem:[#allocation7 + $0xa8] sm:$0xff]  ;;  %p1411_p7 = scmp.lt.s32.totalorder %s1829_s12, %s1409_s10  ;;  %p1412_p9 = scmp.lt.s32.totalorder %s1410_s28, %s1404_s6 }
  0x74   : > { %290 = vadd.xlane.f32.xlu1 %v289_v12  ;;  %287 = vadd.xlane.f32.xlu0 %v286_v13  ;;  %v677_v12 = vld [vmem:[#allocation7 + $0x30] sm:$0xff]  ;;  %v611_v13 = vld [vmem:[#allocation5 + $0x20] sm:$0xff]  ;;  %v630_v58 = vld [vmem:[#allocation5 + $0xb8] sm:$0xff]  ;;  %v1104_v59 = vpack.c.bf16 %v689_v51, %v687_v50  ;;  %p1407_p3 = pneg %p1406_p2 }
  0x75   : > { %v691_v62 = vld [vmem:[#allocation7 + $0xa0] sm:$0xff]  ;;  %v693_v63 = vld [vmem:[#allocation7 + $0xb0] sm:$0xff]  ;;  %p1413_p12 = por %p1412_p9, %p1411_p7 }
  0x76   : > { %v627_v3 = vld [vmem:[#allocation5 + $0xa0] sm:$0xff]  ;;  %v641_v50 = vld [vmem:[#allocation5 + $0x110] sm:$0xff] }
  0x77   : > { %p1414_p1 = pnand %p1413_p12, %p1407_p3 }
  0x78   : > { %307 = vmax.xlane.f32.xlu1 %v306_v14  ;;  %304 = vmax.xlane.f32.xlu0 %v303_v15  ;;  %v1092_v14 = vpack.c.bf16 %v677_v12, %v675_v7  ;;  %v613_v15 = vld [vmem:[#allocation5 + $0x30] sm:$0xff]  ;;  %v696_v7 = vld [vmem:[#allocation7 + $0xc8] sm:$0xff]  ;;  %v698_v12 = vld [vmem:[#allocation7 + $0xd8] sm:$0xff] }
  0xf9   : > { %v299_v18 = vpop.xlane.xlu1 %298  ;;  %v282_v19 = vpop.xlane.xlu0 %281 }
  0xfa   : > { %v293_v20 = vmul.f32 0.00390625, %v282_v19 }
  0xfc   : > { %v310_v24 = vsel %vm309_vm1, %v293_v20, %v299_v18  ;;  %v1156_v18 = vpack.c.bf16 %v613_v15, %v611_v13  ;;  %v616_v20 = vld [vmem:[#allocation5 + $0x48] sm:$0xff]  ;;  %v1108_v15 = vpack.c.bf16 %v693_v63, %v691_v62 }
  0xfd   : > { %v302_v21 = vpop.xlane.xlu1 %301  ;;  %v285_v22 = vpop.xlane.xlu0 %284  ;;  %v632_v13 = vld [vmem:[#allocation5 + $0xc8] sm:$0xff] }
  0xfe   : > { %v294_v23 = vmul.f32 0.00390625, %v285_v22  ;;  %v679_v22 = vld [vmem:[#allocation7 + $0x40] sm:$0xff] }
 0x100   : > { %v311_v25 = vsel %vm309_vm1, %v294_v23, %v302_v21  ;;  %v618_v21 = vld [vmem:[#allocation5 + $0x58] sm:$0xff] }
 0x101   : > { %v291_v26 = vpop.xlane.xlu1 %290  ;;  %v288_v27 = vpop.xlane.xlu0 %287  ;;  %v1081_v28 = vpack.c.bf16 %v311_v25, %v310_v24  ;;  %v1158_v23 = vpack.c.bf16 %v618_v21, %v616_v20  ;;  %v681_v24 = vld [vmem:[#allocation7 + $0x50] sm:$0xff]  ;;  %v615_v25 = vld [vmem:[#allocation5 + $0x40] sm:$0xff] }
 0x102   : > { %v296_v29 = vmul.f32 0.00390625, %v291_v26  ;;  %v295_v30 = vmul.f32 0.00390625, %v288_v27  ;;  %v617_v26 = vld [vmem:[#allocation5 + $0x50] sm:$0xff]  ;;  %v1096_v27 = vpack.c.bf16 %v681_v24, %v679_v22  ;;  %v631_v20 = vld [vmem:[#allocation5 + $0xc0] sm:$0xff]  ;;  %v702_v24 = vld [vmem:[#allocation7 + $0xf8] sm:$0xff] }
 0x103   : > { %1082 = vmatpush3.bf16.msra.mxu0 %v1081_v28  ;;  %v684_v28 = vld [vmem:[#allocation7 + $0x68] sm:$0xff]  ;;  %v633_v22 = vld [vmem:[#allocation5 + $0xd0] sm:$0xff] }
 0x104   : > { %1083 = vmatprep.subr.bf16.mxu0 %v1481_v16  ;;  %v680_v16 = vld [vmem:[#allocation7 + $0x48] sm:$0xff] }
 0x105   : > { %v308_v31 = vpop.xlane.xlu1 %307  ;;  %v305_v32 = vpop.xlane.xlu0 %304  ;;  %v1094_v19 = vpack.c.bf16 %v682_v17, %v680_v16  ;;  %v1110_v17 = vpack.c.bf16 %v698_v12, %v696_v7 }
 0x106   : > { %v313_v33 = vsel %vm309_vm1, %v296_v29, %v308_v31  ;;  %v312_v34 = vsel %vm309_vm1, %v295_v30, %v305_v32  ;;  %v686_v29 = vld [vmem:[#allocation7 + $0x78] sm:$0xff]  ;;  %v620_v30 = vld [vmem:[#allocation5 + $0x68] sm:$0xff]  ;;  %v1160_v31 = vpack.c.bf16 %v617_v26, %v615_v25 }
 0x107   : > { %v1084_v35 = vpack.c.bf16 %v313_v33, %v312_v34  ;;  %v1098_v32 = vpack.c.bf16 %v686_v29, %v684_v28  ;;  %v622_v33 = vld [vmem:[#allocation5 + $0x78] sm:$0xff]  ;;  %v683_v34 = vld [vmem:[#allocation7 + $0x60] sm:$0xff]  ;;  %v636_v25 = vld [vmem:[#allocation5 + $0xe8] sm:$0xff]  ;;  %v1176_v28 = vpack.c.bf16 %v633_v22, %v631_v20 }
 0x108   : > { %v638_v26 = vld [vmem:[#allocation5 + $0xf8] sm:$0xff] }
 0x109   : > { %1085 = vmatpush3.bf16.msra.mxu0 %v1084_v35  ;;  %v685_v35 = vld [vmem:[#allocation7 + $0x70] sm:$0xff] }
 0x10a   : > { %1087 = vmatprep.subr.bf16.mxu0 %v1086_v52  ;;  %v623_v52 = vld [vmem:[#allocation5 + $0x80] sm:$0xff] }
 0x10b   : > { %v1168_v60 = vpack.c.bf16 %v625_v54, %v623_v52 }
 0x10c   : > { %1070 = vmatmul.mubr.msk.f32.vlgmr.msra.gmra.mrb[0].mxu0 %vm315_vm2, %v314_v36  ;;  %v1162_v36 = vpack.c.bf16 %v622_v33, %v620_v30  ;;  %v699_v30 = vld [vmem:[#allocation7 + $0xe0] sm:$0xff]  ;;  %v1178_v33 = vpack.c.bf16 %v638_v26, %v636_v25 }
 0x10d   : > { %1089 = vmatpush1.bf16.msra.mxu0 %v1088_v57  ;;  %v628_v57 = vld [vmem:[#allocation5 + $0xa8] sm:$0xff] }
 0x10e   : > { %1091 = vmatprep.subr.bf16.mxu0 %v1090_v4  ;;  %v1170_v4 = vpack.c.bf16 %v630_v58, %v628_v57 }
 0x111   : > { %1093 = vmatpush1.bf16.msra.mxu0 %v1092_v14  ;;  %v634_v14 = vld [vmem:[#allocation5 + $0xd8] sm:$0xff] }
 0x112   : > { %1095 = vmatprep.subr.bf16.mxu0 %v1094_v19  ;;  %v697_v19 = vld [vmem:[#allocation7 + $0xd0] sm:$0xff]  ;;  %v1174_v21 = vpack.c.bf16 %v634_v14, %v632_v13 }
 0x115   : > { %1097 = vmatpush1.bf16.msra.mxu0 %v1096_v27 }
 0x116   : > { %1099 = vmatprep.subr.bf16.mxu0 %v1098_v32  ;;  %v635_v32 = vld [vmem:[#allocation5 + $0xe0] sm:$0xff] }
 0x1df   : > { %v385_v38 = vpop.f32.mrb[0].mxu0 }
 0x1e0   : > { %v389_v39 = vmax.f32 %v385_v38, 0.0  ;;  %v1071_v40 = vpop.f32.mrb[1].mxu0  ;;  %v621_v38 = vld [vmem:[#allocation5 + $0x70] sm:$0xff] }
 0x1e1   : > { %v690_v40 = vld [vmem:[#allocation7 + $0x98] sm:$0xff]  ;;  %v1164_v48 = vpack.c.bf16 %v621_v38, %v619_v37  ;;  %v640_v37 = vld [vmem:[#allocation5 + $0x108] sm:$0xff] }
 0x1e2   : > { %1072 = vmatprep.subr.msk.mxu1 %vm407_vm4, %v389_v39  ;;  %v642_v38 = vld [vmem:[#allocation5 + $0x118] sm:$0xff] }
 0x1e3   : > { %1073 = vmatpush3.msk.msra.mxu1 %vm407_vm4, %v389_v39  ;;  %v688_v39 = vld [vmem:[#allocation7 + $0x88] sm:$0xff] }
 0x1e4   : > { %1075 = vmatmul.mubr.msk.f32.vlgmr.msra.gmra.mrb[0].mxu1 %vm394_vm3, %v391_v41  ;;  %1151 = vmatprep.subr.bf16.mxu1 %v1150_v56  ;;  %v624_v41 = vld [vmem:[#allocation5 + $0x88] sm:$0xff]  ;;  %v1102_v49 = vpack.c.bf16 %v690_v40, %v688_v39  ;;  %v694_v56 = vld [vmem:[#allocation7 + $0xb8] sm:$0xff] }
 0x1e5   : > { %1077 = vmatprep.mubr.msk.f32.mxu1 %vm394_vm3, %v392_v42  ;;  %1153 = vmatpush1.bf16.msra.mxu1 %v1152_v61  ;;  %v626_v42 = vld [vmem:[#allocation5 + $0x98] sm:$0xff]  ;;  %v1106_v61 = vpack.c.bf16 %v694_v56, %v692_v55 }
 0x1e6   : > { %1155 = vmatprep.subr.bf16.mxu1 %v1154_v6  ;;  %v1166_v53 = vpack.c.bf16 %v626_v42, %v624_v41  ;;  %v629_v6 = vld [vmem:[#allocation5 + $0xb0] sm:$0xff]  ;;  %v703_v42 = vld [vmem:[#allocation7 + $0x100] sm:$0xff] }
 0x1e7   : > { %v1172_v16 = vpack.c.bf16 %v629_v6, %v627_v3 }
 0x1e8   : > { %1078 = vmatmul.mubr.msk.f32.gmra.mrb[2].mxu1 %vm394_vm3, %v393_v43  ;;  %v1100_v43 = vpack.c.bf16 %v685_v35, %v683_v34  ;;  %v637_v34 = vld [vmem:[#allocation5 + $0xf0] sm:$0xff]  ;;  %v704_v35 = vld [vmem:[#allocation7 + $0x108] sm:$0xff] }
 0x1e9   : > { %1157 = vmatpush1.bf16.msra.mxu1 %v1156_v18  ;;  %v695_v18 = vld [vmem:[#allocation7 + $0xc0] sm:$0xff]  ;;  %v1180_v40 = vpack.c.bf16 %v637_v34, %v635_v32 }
 0x1ea   : > { %1159 = vmatprep.subr.bf16.mxu1 %v1158_v23  ;;  %1101 = vmatpush1.bf16.msra.mxu0 %v1100_v43  ;;  %v700_v23 = vld [vmem:[#allocation7 + $0xe8] sm:$0xff]  ;;  %v1112_v27 = vpack.c.bf16 %v697_v19, %v695_v18  ;;  %v705_v43 = vld [vmem:[#allocation7 + $0x110] sm:$0xff]  ;;  %v646_v18 = vld [vmem:[#allocation5 + $0x138] sm:$0xff] }
 0x1eb   : > { %1103 = vmatprep.subr.bf16.mxu0 %v1102_v49  ;;  %v1114_v29 = vpack.c.bf16 %v702_v24, %v700_v23  ;;  %v639_v49 = vld [vmem:[#allocation5 + $0x100] sm:$0xff]  ;;  %v1120_v51 = vpack.c.bf16 %v705_v43, %v703_v42  ;;  %v709_v19 = vld [vmem:[#allocation7 + $0x130] sm:$0xff]  ;;  %v652_v42 = vld [vmem:[#allocation5 + $0x168] sm:$0xff] }
 0x1ec   : > { %v1184_v52 = vpack.c.bf16 %v641_v50, %v639_v49  ;;  %v643_v23 = vld [vmem:[#allocation5 + $0x120] sm:$0xff]  ;;  %v645_v24 = vld [vmem:[#allocation5 + $0x130] sm:$0xff] }
 0x1ed   : > { %1161 = vmatpush1.bf16.msra.mxu1 %v1160_v31  ;;  %v701_v31 = vld [vmem:[#allocation7 + $0xf0] sm:$0xff]  ;;  %v1188_v26 = vpack.c.bf16 %v645_v24, %v643_v23  ;;  %v711_v32 = vld [vmem:[#allocation7 + $0x140] sm:$0xff]  ;;  %v664_v23 = vld [vmem:[#allocation5 + $0x1c8] sm:$0xff] }
 0x1ee   : > { %1163 = vmatprep.subr.bf16.mxu1 %v1162_v36  ;;  %1105 = vmatpush1.bf16.msra.mxu0 %v1104_v59  ;;  %v706_v36 = vld [vmem:[#allocation7 + $0x118] sm:$0xff]  ;;  %v1116_v39 = vpack.c.bf16 %v701_v31, %v699_v30  ;;  %v715_v49 = vld [vmem:[#allocation7 + $0x160] sm:$0xff]  ;;  %v717_v50 = vld [vmem:[#allocation7 + $0x170] sm:$0xff] }
 0x1ef   : > { %1107 = vmatprep.subr.bf16.mxu0 %v1106_v61  ;;  %v1118_v41 = vpack.c.bf16 %v706_v36, %v704_v35  ;;  %v650_v31 = vld [vmem:[#allocation5 + $0x158] sm:$0xff]  ;;  %v647_v36 = vld [vmem:[#allocation5 + $0x140] sm:$0xff] }
 0x1f1   : > { %1165 = vmatpush1.bf16.msra.mxu1 %v1164_v48  ;;  %v1182_v48 = vpack.c.bf16 %v642_v38, %v640_v37  ;;  %v649_v37 = vld [vmem:[#allocation5 + $0x150] sm:$0xff] }
 0x1f2   : > { %1167 = vmatprep.subr.bf16.mxu1 %v1166_v53  ;;  %1109 = vmatpush1.bf16.msra.mxu0 %v1108_v15  ;;  %v708_v15 = vld [vmem:[#allocation7 + $0x128] sm:$0xff] }
 0x1f3   : > { %1111 = vmatprep.subr.bf16.mxu0 %v1110_v17 }
 0x1f5   : > { %1169 = vmatpush1.bf16.msra.mxu1 %v1168_v60 }
 0x1f6   : > { %1171 = vmatprep.subr.bf16.mxu1 %v1170_v4  ;;  %1113 = vmatpush1.bf16.msra.mxu0 %v1112_v27  ;;  %v712_v27 = vld [vmem:[#allocation7 + $0x148] sm:$0xff] }
 0x1f7   : > { %1115 = vmatprep.subr.bf16.mxu0 %v1114_v29  ;;  %v648_v29 = vld [vmem:[#allocation5 + $0x148] sm:$0xff] }
 0x1f8   : > { %v1190_v34 = vpack.c.bf16 %v650_v31, %v648_v29  ;;  %v665_v31 = vld [vmem:[#allocation5 + $0x1d0] sm:$0xff] }
 0x1f9   : > { %1173 = vmatpush1.bf16.msra.mxu1 %v1172_v16  ;;  %v644_v16 = vld [vmem:[#allocation5 + $0x128] sm:$0xff] }
 0x1fa   : > { %1175 = vmatprep.subr.bf16.mxu1 %v1174_v21  ;;  %1117 = vmatpush1.bf16.msra.mxu0 %v1116_v39  ;;  %v1186_v21 = vpack.c.bf16 %v646_v18, %v644_v16  ;;  %v1192_v39 = vpack.c.bf16 %v649_v37, %v647_v36  ;;  %v725_v16 = vld [vmem:[#allocation7 + $0x1b0] sm:$0xff]  ;;  %v670_v37 = vld [vmem:[#allocation5 + $0x1f8] sm:$0xff] }
 0x1fb   : > { %1119 = vmatprep.subr.bf16.mxu0 %v1118_v41  ;;  %v718_v41 = vld [vmem:[#allocation7 + $0x178] sm:$0xff] }
 0x1fd   : > { %1177 = vmatpush1.bf16.msra.mxu1 %v1176_v28  ;;  %v714_v28 = vld [vmem:[#allocation7 + $0x158] sm:$0xff] }
 0x1fe   : > { %1179 = vmatprep.subr.bf16.mxu1 %v1178_v33  ;;  %1121 = vmatpush1.bf16.msra.mxu0 %v1120_v51  ;;  %v1126_v30 = vpack.c.bf16 %v714_v28, %v712_v27  ;;  %v713_v33 = vld [vmem:[#allocation7 + $0x150] sm:$0xff] }
 0x1ff   : > { %v1128_v35 = vpack.c.bf16 %v713_v33, %v711_v32  ;;  %v729_v27 = vld [vmem:[#allocation7 + $0x1d0] sm:$0xff]  ;;  %v732_v33 = vld [vmem:[#allocation7 + $0x1e8] sm:$0xff] }
 0x201   : > { %1181 = vmatpush1.bf16.msra.mxu1 %v1180_v40  ;;  %v716_v40 = vld [vmem:[#allocation7 + $0x168] sm:$0xff] }
 0x202   : > { %1183 = vmatprep.subr.bf16.mxu1 %v1182_v48  ;;  %v1130_v43 = vpack.c.bf16 %v718_v41, %v716_v40  ;;  %v654_v48 = vld [vmem:[#allocation5 + $0x178] sm:$0xff] }
 0x203   : > { %v1194_v51 = vpack.c.bf16 %v654_v48, %v652_v42  ;;  %v667_v42 = vld [vmem:[#allocation5 + $0x1e0] sm:$0xff] }
 0x205   : > { %1185 = vmatpush1.bf16.msra.mxu1 %v1184_v52  ;;  %v1132_v52 = vpack.c.bf16 %v717_v50, %v715_v49 }
 0x206   : > { %1187 = vmatprep.subr.bf16.mxu1 %v1186_v21  ;;  %v728_v21 = vld [vmem:[#allocation7 + $0x1c8] sm:$0xff] }
 0x209   : > { %1189 = vmatpush1.bf16.msra.mxu1 %v1188_v26  ;;  %v727_v26 = vld [vmem:[#allocation7 + $0x1c0] sm:$0xff] }
 0x20a   : > { %1191 = vmatprep.subr.bf16.mxu1 %v1190_v34  ;;  %v1144_v29 = vpack.c.bf16 %v729_v27, %v727_v26  ;;  %v734_v34 = vld [vmem:[#allocation7 + $0x1f8] sm:$0xff] }
 0x20b   : > { %v1146_v36 = vpack.c.bf16 %v734_v34, %v732_v33 }
 0x20d   : > { %1193 = vmatpush1.bf16.msra.mxu1 %v1192_v39  ;;  %v733_v39 = vld [vmem:[#allocation7 + $0x1f0] sm:$0xff] }
 0x20e   : > { %1195 = vmatprep.subr.bf16.mxu1 %v1194_v51 }
 0x2b7   : > { %v1761_v44 = vpop.f32.mrb[0].mxu1 }
 0x2b8   : > { %502 = vrot.lane.b32.xlu1 %v1761_v44, %s1484_s17  ;;  %v1764_v45 = vpop.f32.mrb[1].mxu1 }
 0x2b9   : > { %500 = vrot.lane.b32.xlu0 %v1764_v45, %s1484_s17 }
 0x2bb   : > { %v1767_v46 = vpop.f32.mrb[2].mxu1 }
 0x2bc   : > { %v1769_v47 = vpop.f32.mrb[3].mxu1 }
 0x2bd   : > { %504 = vrot.lane.b32.xlu1 %v1769_v47, %s1484_s17 }
 0x2c1   : > { %506 = vrot.lane.b32.xlu1 %v1767_v46, %s1484_s17 }
 0x32a   : > { %v503_v53 = vpop.permute.xlu1 %502 }
 0x32b   : > { %v513_v54 = vadd.f32 %v1761_v44, %v503_v53  ;;  %v501_v55 = vpop.permute.xlu0 %500  ;;  %v651_v53 = vld [vmem:[#allocation5 + $0x160] sm:$0xff] }
 0x32c   : > { %v512_v56 = vadd.f32 %v501_v55, %v1764_v45 }
 0x32d   : > { %v1039_v57 = vmul.f32 -1.442695, %v513_v54  ;;  %v653_v54 = vld [vmem:[#allocation5 + $0x170] sm:$0xff] }
 0x32e   : > { %v1038_v58 = vmul.f32 -1.442695, %v512_v56  ;;  %v1196_v56 = vpack.c.bf16 %v653_v54, %v651_v53 }
 0x32f   : > { %1294 = vpow2.f32 %v1039_v57  ;;  %v505_v59 = vpop.permute.xlu1 %504  ;;  %v720_v57 = vld [vmem:[#allocation7 + $0x188] sm:$0xff] }
 0x330   : > { %1296 = vpow2.f32 %v1038_v58  ;;  %v514_v60 = vadd.f32 %v505_v59, %v1769_v47  ;;  %v710_v47 = vld [vmem:[#allocation7 + $0x138] sm:$0xff]  ;;  %v656_v59 = vld [vmem:[#allocation5 + $0x188] sm:$0xff]  ;;  %1197 = vmatpush1.bf16.msra.mxu1 %v1196_v56 }
 0x331   : > { %v1122_v17 = vpack.c.bf16 %v710_v47, %v708_v15  ;;  %v722_v58 = vld [vmem:[#allocation7 + $0x198] sm:$0xff]  ;;  %v723_v47 = vld [vmem:[#allocation7 + $0x1a0] sm:$0xff] }
 0x332   : > { %v1040_v61 = vmul.f32 -1.442695, %v514_v60  ;;  %v1134_v60 = vpack.c.bf16 %v722_v58, %v720_v57  ;;  %v662_v15 = vld [vmem:[#allocation5 + $0x1b8] sm:$0xff]  ;;  %v1140_v18 = vpack.c.bf16 %v725_v16, %v723_v47 }
 0x333   : > { %v507_v62 = vpop.permute.xlu1 %506  ;;  %1123 = vmatprep.subr.bf16.mxu0 %v1122_v17 }
 0x334   : > { %1298 = vpow2.f32 %v1040_v61  ;;  %v515_v63 = vadd.f32 %v1767_v46, %v507_v62  ;;  %v707_v46 = vld [vmem:[#allocation7 + $0x120] sm:$0xff]  ;;  %v658_v61 = vld [vmem:[#allocation5 + $0x198] sm:$0xff] }
 0x335   : > { %v1124_v22 = vpack.c.bf16 %v709_v19, %v707_v46  ;;  %v719_v62 = vld [vmem:[#allocation7 + $0x180] sm:$0xff]  ;;  %v661_v19 = vld [vmem:[#allocation5 + $0x1b0] sm:$0xff] }
 0x336   : > { %v1041_v3 = vmul.f32 -1.442695, %v515_v63  ;;  %v721_v63 = vld [vmem:[#allocation7 + $0x190] sm:$0xff]  ;;  %v659_v46 = vld [vmem:[#allocation5 + $0x1a0] sm:$0xff] }
 0x337   : > { %1125 = vmatpush1.bf16.msra.mxu0 %v1124_v22  ;;  %v730_v22 = vld [vmem:[#allocation7 + $0x1d8] sm:$0xff] }
 0x338   : > { %1300 = vpow2.f32 %v1041_v3  ;;  %1127 = vmatprep.subr.bf16.mxu0 %v1126_v30  ;;  %v1198_v3 = vpack.c.bf16 %v658_v61, %v656_v59  ;;  %v1142_v24 = vpack.c.bf16 %v730_v22, %v728_v21  ;;  %v663_v30 = vld [vmem:[#allocation5 + $0x1c0] sm:$0xff] }
 0x339   : > { %v1295_v4 = vpop.eup %1294  ;;  %v1208_v32 = vpack.c.bf16 %v665_v31, %v663_v30 }
 0x33a   : > { %v1297_v6 = vpop.eup %1296  ;;  %v529_v44 = vadd.f32 1.0, %v1295_v4  ;;  %v1136_v4 = vpack.c.bf16 %v721_v63, %v719_v62  ;;  %1199 = vmatprep.subr.bf16.mxu1 %v1198_v3 }
 0x33b   : > { %v528_v7 = vadd.f32 1.0, %v1297_v6  ;;  %1129 = vmatpush1.bf16.msra.mxu0 %v1128_v35  ;;  %v655_v6 = vld [vmem:[#allocation5 + $0x180] sm:$0xff]  ;;  %v668_v35 = vld [vmem:[#allocation5 + $0x1e8] sm:$0xff] }
 0x33c   : > { %1302 = vrcp.f32 %v529_v44  ;;  %1131 = vmatprep.subr.bf16.mxu0 %v1130_v43  ;;  %v657_v44 = vld [vmem:[#allocation5 + $0x190] sm:$0xff]  ;;  %v1210_v40 = vpack.c.bf16 %v670_v37, %v668_v35 }
 0x33d   : > { %1304 = vrcp.f32 %v528_v7  ;;  %v1200_v7 = vpack.c.bf16 %v657_v44, %v655_v6  ;;  %v669_v43 = vld [vmem:[#allocation5 + $0x1f0] sm:$0xff] }
 0x33e   : > { %v1299_v45 = vpop.eup %1298  ;;  %v1212_v48 = vpack.c.bf16 %v669_v43, %v667_v42  ;;  %v889_v42 = vlaneseq }
 0x33f   : > { %v530_v12 = vadd.f32 1.0, %v1299_v45  ;;  %1133 = vmatpush1.bf16.msra.mxu0 %v1132_v52  ;;  %v724_v45 = vld [vmem:[#allocation7 + $0x1a8] sm:$0xff]  ;;  %1201 = vmatpush1.bf16.msra.mxu1 %v1200_v7 }
 0x340   : > { %1135 = vmatprep.subr.bf16.mxu0 %v1134_v60 }
 0x341   : > { %1306 = vrcp.f32 %v530_v12  ;;  %v726_v12 = vld [vmem:[#allocation7 + $0x1b8] sm:$0xff] }
 0x342   : > { %v1301_v13 = vpop.eup %1300 }
 0x343   : > { %v531_v14 = vadd.f32 1.0, %v1301_v13  ;;  %v660_v13 = vld [vmem:[#allocation5 + $0x1a8] sm:$0xff]  ;;  %1137 = vmatpush1.bf16.msra.mxu0 %v1136_v4 }
 0x344   : > { %v1202_v17 = vpack.c.bf16 %v662_v15, %v660_v13 }
 0x345   : > { %1308 = vrcp.f32 %v531_v14  ;;  %v1138_v14 = vpack.c.bf16 %v726_v12, %v724_v45 }
 0x346   : > { %v1303_v20 = vpop.eup %1302  ;;  %1203 = vmatprep.subr.bf16.mxu1 %v1202_v17 }
 0x347   : > { %v1305_v25 = vpop.eup %1304  ;;  %547 = vperm.xlu1 %1292, %v1303_v20   ;;  %1139 = vmatprep.subr.bf16.mxu0 %v1138_v14  ;;  %v1204_v20 = vpack.c.bf16 %v661_v19, %v659_v46 }
 0x348   : > { %542 = vperm.xlu0 %1293, %v1305_v25   ;;  %1141 = vmatpush1.bf16.msra.mxu0 %v1140_v18  ;;  %v666_v25 = vld [vmem:[#allocation5 + $0x1d8] sm:$0xff] }
 0x349   : > { %1205 = vmatpush1.bf16.msra.mxu1 %v1204_v20  ;;  %v1206_v28 = vpack.c.bf16 %v666_v25, %v664_v23  ;;  %1143 = vmatprep.subr.bf16.mxu0 %v1142_v24 }
 0x34b   : > { %v1307_v38 = vpop.eup %1306  ;;  %1207 = vmatprep.subr.bf16.mxu1 %v1206_v28 }
 0x34c   : > { %552 = vperm.xlu1 %1292, %v1307_v38   ;;  %1145 = vmatpush1.bf16.msra.mxu0 %v1144_v29  ;;  %v731_v38 = vld [vmem:[#allocation7 + $0x1e0] sm:$0xff] }
 0x34d   : > { %1209 = vmatpush1.bf16.msra.mxu1 %v1208_v32  ;;  %v1148_v41 = vpack.c.bf16 %v733_v39, %v731_v38  ;;  %1147 = vmatprep.subr.bf16.mxu0 %v1146_v36 }
 0x34e   : > { %1211 = vmatprep.subr.bf16.mxu1 %v1210_v40 }
 0x34f   : > { %v1309_v55 = vpop.eup %1308 }
 0x350   : > { %557 = vperm.xlu0 %1293, %v1309_v55   ;;  %1149 = vmatpush1.bf16.msra.mxu0 %v1148_v41 }
 0x351   : > { %1213 = vmatpush1.bf16.msra.mxu1 %v1212_v48  ;;  %v890_v48 = vshrl.u32 %v889_v42, 7 }
 0x3c6   : > { %v548_v49 = vpop.permute.xlu1 %547 }
 0x3c7   : > { %v543_v50 = vpop.permute.xlu0 %542  ;;  %v1778_v51 = vmul.f32 %v548_v49, %v1718_v2  ;;  %v1781_v52 = vmul.f32 %v548_v49, %v1724_v5  ;;  %v891_v49 = vsub.s32 0, %v890_v48 }
 0x3c8   : > { %v1784_v53 = vmul.f32 %v543_v50, %v1714_v0  ;;  %v1787_v54 = vmul.f32 %v543_v50, %v1716_v1 }
 0x3ca   : > { %v568_v2 = vadd.f32 %v1778_v51, %v1784_v53  ;;  %v577_v5 = vadd.f32 %v1781_v52, %v1787_v54 }
 0x3cb   : > { %v553_v55 = vpop.permute.xlu1 %552 }
 0x3cc   : > { %v1790_v56 = vmul.f32 %v553_v55, %v1734_v10  ;;  %v1793_v57 = vmul.f32 %v553_v55, %v1736_v11 }
 0x3ce   : > { %v569_v0 = vadd.f32 %v568_v2, %v1790_v56  ;;  %v578_v59 = vadd.f32 %v577_v5, %v1793_v57  ;;  %v589_v11 = vmax.f32 %v1784_v53, %v1790_v56  ;;  %v598_v60 = vmax.f32 %v1787_v54, %v1793_v57 }
 0x3cf   : > { %v558_v58 = vpop.permute.xlu0 %557 }
 0x3d0   : > { %v1802_v1 = vmul.f32 %v558_v58, %v1730_v8  ;;  %v1805_v10 = vmul.f32 %v558_v58, %v1732_v9 }
 0x3d2   : > { %v570_v61 = vadd.f32 %v569_v0, %v1802_v1  ;;  %v579_v62 = vadd.f32 %v578_v59, %v1805_v10  ;;  %v590_v63 = vmax.f32 %v1778_v51, %v1802_v1  ;;  %v599_v8 = vmax.f32 %v1781_v52, %v1805_v10 }
 0x3d4   : > { %v571_v3 = vrot.slane %v570_v61, 4  ;;  %v580_v4 = vrot.slane %v579_v62, 4  ;;  %v591_v9 = vmax.f32 %v589_v11, %v590_v63  ;;  %v600_v6 = vmax.f32 %v598_v60, %v599_v8 }
 0x3d6   : > { %v572_v44 = vadd.f32 %v571_v3, %v570_v61  ;;  %v581_v7 = vadd.f32 %v580_v4, %v579_v62  ;;  %v592_v45 = vrot.slane %v591_v9, 4  ;;  %v601_v12 = vrot.slane %v600_v6, 4 }
 0x3d8   : > { %v573_v13 = vrot.slane %v572_v44, 2  ;;  %v593_v14 = vmax.f32 %v591_v9, %v592_v45  ;;  %v602_v15 = vmax.f32 %v600_v6, %v601_v12  ;;  %v582_v47 = vrot.slane %v581_v7, 2 }
 0x3da   : > { %v574_v16 = vadd.f32 %v573_v13, %v572_v44  ;;  %v594_v17 = vrot.slane %v593_v14, 2  ;;  %v603_v18 = vrot.slane %v602_v15, 2  ;;  %v583_v46 = vadd.f32 %v582_v47, %v581_v7 }
 0x3dc   : > { %v575_v19 = vrot.slane %v574_v16, 1  ;;  %v604_v20 = vmax.f32 %v602_v15, %v603_v18  ;;  %v584_v21 = vrot.slane %v583_v46, 1  ;;  %v595_v22 = vmax.f32 %v593_v14, %v594_v17 }
 0x3de   : > { %v576_v23 = vadd.f32 %v575_v19, %v574_v16  ;;  %v605_v24 = vrot.slane %v604_v20, 1  ;;  %v585_v25 = vadd.f32 %v584_v21, %v583_v46  ;;  %v596_v26 = vrot.slane %v595_v22, 1 }
 0x3e0   : > { %v587_v27 = vmul.f32 0.03125, %v576_v23  ;;  %v606_v28 = vmax.f32 %v604_v20, %v605_v24  ;;  %v588_v29 = vmul.f32 0.03125, %v585_v25  ;;  %v597_v30 = vmax.f32 %v595_v22, %v596_v26 }
 0x3e2   : > { %799 = vmatprep.mubr.f32.mxu0 %v606_v28  ;;  %870 = vmatprep.mubr.f32.mxu1 %v588_v29 }
 0x3e3   : > { %800 = vmatmul.mubr.f32.vlgmr.msra.gmra.mrb[2].mxu0 %v597_v30  ;;  %871 = vmatmul.mubr.f32.vlgmr.msra.gmra.mrb[4].mxu1 %v587_v27 }
 0x4b6   : > { %v801_v31 = vpop.f32.mrb[2].mxu0  ;;  %v872_v32 = vpop.f32.mrb[4].mxu1 }
 0x4b7   : > { %v873_v33 = vadd.f32 %v872_v32, %v801_v31  ;;  %v803_v34 = vpop.f32.mrb[3].mxu0  ;;  %v874_v35 = vpop.f32.mrb[5].mxu1 }
 0x4b8   : > { %v875_v36 = vadd.f32 %v874_v35, %v803_v34 }
 0x4b9   : > { %v1042_v37 = vmul.f32 -1.442695, %v873_v33 }
 0x4ba   : > { %v1043_v38 = vmul.f32 -1.442695, %v875_v36 }
 0x4bb   : > { %1310 = vpow2.f32 %v1042_v37 }
 0x4bc   : > { %1312 = vpow2.f32 %v1043_v38 }
 0x4c5   : > { %v1311_v39 = vpop.eup %1310 }
 0x4c6   : > { %v1313_v40 = vpop.eup %1312  ;;  %v883_v41 = vadd.f32 1.0, %v1311_v39 }
 0x4c7   : > { %v884_v43 = vadd.f32 1.0, %v1313_v40 }
 0x4c8   : > { %1314 = vrcp.f32 %v883_v41 }
 0x4c9   : > { %1316 = vrcp.f32 %v884_v43 }
 0x4d2   : > { %v1315_v50 = vpop.eup %1314 }
 0x4d3   : > { %v1317_v55 = vpop.eup %1316  ;;  %v892_v2 = vrot.slane %v1315_v50, %v891_v49 }
 0x4d4   : > { %v896_v5 = vrot.slane %v1317_v55, %v891_v49 }
 0x4d5   : > { %v897_v58 = vmul.f32 %v892_v2, %v1784_v53  ;;  %v899_v0 = vmul.f32 %v892_v2, %v1778_v51  ;;  %v901_v59 = vmul.f32 %v892_v2, %v1790_v56  ;;  %v903_v11 = vmul.f32 %v892_v2, %v1802_v1 }
 0x4d6   : > { %v898_v60 = vmul.f32 %v896_v5, %v1787_v54  ;;  %v900_v53 = vmul.f32 %v896_v5, %v1781_v52  ;;  %v902_v51 = vmul.f32 %v896_v5, %v1793_v57  ;;  %v904_v56 = vmul.f32 %v896_v5, %v1805_v10 }
 0x4d7   : > { %905 = vst [vmem:[%s271_s8] sm:$0xff] %v897_v58  ;;  %907 = vst [vmem:[%s271_s8 + $0x10] sm:$0xff] %v899_v0 }
 0x4d8   : > { %909 = vst [vmem:[%s271_s8 + $0x20] sm:$0xff] %v901_v59  ;;  %911 = vst [vmem:[%s271_s8 + $0x30] sm:$0xff] %v903_v11 }
 0x4d9   : > { %906 = vst [vmem:[%s271_s8 + $0x8] sm:$0xff] %v898_v60  ;;  %908 = vst [vmem:[%s271_s8 + $0x18] sm:$0xff] %v900_v53 }
 0x4da   : > { %910 = vst [vmem:[%s271_s8 + $0x28] sm:$0xff] %v902_v51  ;;  %912 = vst [vmem:[%s271_s8 + $0x38] sm:$0xff] %v904_v56 }
 0x4db   : > { %1417 = shalt.err (!%p1414_p1)
}
 0x4dc   : > { %s1418_s13 = scalar_lea.hbm %s1827_s15, 1024  ;;  %s1422_s11 = scalar_lea.hbm %s1882_s5, 2048 }
 0x4dd   : > { %p1419_p13 = scmp.ne.s32.totalorder %s1827_s15, %s1418_s13  ;;  %p1423_p4 = scmp.lt.u32.totalorder %s1827_s15, %s1882_s5 }
 0x4de   : > { %p1424_p5 = scmp.lt.u32.totalorder %s1422_s11, %s1418_s13  ;;  %p1426_p11 = scmp.lt.u32.totalorder %s1418_s13, %s1827_s15 }
 0x4df   : > { %p1420_p6 = pnand %p1419_p13, %p1896_p0 }
 0x4e0   : > { %p1425_p8 = por %p1424_p5, %p1423_p4 }
 0x4e1   : > { %p1421_p10 = pneg %p1420_p6 }
 0x4e2   : > { %p1427_p2 = por %p1426_p11, %p1425_p8 }
 0x4e4   : > { %p1428_p3 = pnand %p1427_p2, %p1421_p10 }
 0x4e6   : > { %1431 = shalt.err (!%p1428_p3)
}
 0x4e7   : > { %s1487_s8 = smov 256   ;;  %s1488_s24 = smov 16  }
 0x4e8   : > { %1226 = dma.vmem_to_hbm [thread:$0]  (%p1896_p0), %s1829_s12, 1024, %s1827_s15, %s914_s22, %s1487_s8, %s1487_s8, %s1488_s24  }
 0x4e9 PF: > { %s942_s26 = sand.u32 1, %s1462_s18   ;;  %p1897_p7 = scmp.ne.s32.totalorder %s1887_s25, 0 }
 0x4ea   : > { %p1898_p9 = scmp.ge.s32.totalorder %s1474_s21, 2  ;;  %s943_s6 = scalar_lea.sflag [#allocation4], %s942_s26 }
 0x4ec   : > { %p1240_p12 = pnand %p1898_p9, %p1897_p7 }
 0x4ee   : > { %1457 = dma.done.wait (!%p1240_p12), %s943_s6, 1024  }
 0x4ef   : > { %1459 = vsyncadd (!%p1240_p12), %s943_s6, 4294966272  ;;  %p19_p1 = scmp.ge.s32.totalorder %s1635_s29, 4   ;;  %s1899_s18 = smov %s1466_s19 }
 0x4f0   : > { %s1900_s19 = smov %s1470_s20  ;;  %s1901_s20 = smov %s1651_s27 }
 0x4f1   : > { %s1902_s21 = smov %s1635_s29  ;;  %21 = sbr.rel (!%p19_p1) target bundleno = 6 (0x6), region = 93 }
 0x4f8   :  { %948 = vsyncpa [#allocation3], 1 }
 0x4f9   :  { %950 = vsyncpa [#allocation3 + $0x1], 1 }
 0x4fa   :  { %951 = vsyncpa [#allocation6], 1 }
 0x4fb   :  { %952 = vsyncpa [#allocation4], 1 }
 0x4fc   :  { %954 = vsyncpa [#allocation4 + $0x1], 1 }

</bundles_post_ra>
